<compile_context>
chip_gen: v6e
topology: v6e:2x2x1
jax: 0.10.0
libtpu: 0.0.40
codegen_flags: <defaults>
</compile_context>

<pallas_src>
import functools

import jax
import jax.numpy as jnp
from jax.experimental import pallas as pl
from jax.experimental.pallas import tpu as pltpu

_LANE = 128


def _round_up(x, m):
    return ((x + m - 1) // m) * m


def _channel_attention_kernel(x_ref, w1t_ref, w2t_ref, o_ref, acc_ref,
                              *, hw, thw, ragged):
    # x_ref:   (tn, C, thw)   input tile (thw multiple of 128), native dtype
    # w1t_ref: (C, hidden)    fc1 weight transposed, f32
    # w2t_ref: (hidden, C)    fc2 weight transposed, f32
    # o_ref:   (tn, C)        sigmoid(fc2(relu(fc1(maxpool(x))))), x.dtype
    # acc_ref: (tn, C, 128)   running lane-wise max (f32, or bf16 for bf16 x)
    k = pl.program_id(1)

    @pl.when(k == 0)
    def _init():
        acc_ref[...] = jnp.full(acc_ref.shape, -jnp.inf, dtype=acc_ref.dtype)

    acc_dtype = acc_ref.dtype
    neg_inf = jnp.array(-jnp.inf, dtype=acc_dtype)
    tn, c = acc_ref.shape[0], acc_ref.shape[1]
    n_slabs = thw // _LANE

    if ragged:
        # Valid lane count inside this spatial tile (== thw except on the
        # ragged last tile).  Iota is hoisted out of the slab loop; the
        # per-slab mask is a scalar-sub + compare + select (free under DMA).
        valid = jnp.minimum(hw - k * thw, thw)
        lane = jax.lax.broadcasted_iota(jnp.int32, (tn, c, _LANE), 2)

    def load_slab(j):
        # Static lane slices at 128 multiples are layout-preserving.
        v = x_ref[:, :, j * _LANE:(j + 1) * _LANE].astype(acc_dtype)
        if ragged:
            v = jnp.where(lane < (valid - j * _LANE), v, neg_inf)
        return v

    # Stage 1 (VPU only): fold the thw axis into one 128-lane slab with
    # elementwise maxes; no per-tile cross-lane reduce.
    partial = load_slab(0)
    for j in range(1, n_slabs):       # static unroll, <= 64 slabs
        partial = jnp.maximum(partial, load_slab(j))
    acc_ref[...] = jnp.maximum(acc_ref[...], partial)

    # Finalize once per output block: one cross-lane reduce (XLU), two tiny
    # 1x1-conv matmuls (MXU) and the sigmoid (EUP) ride under the last DMA.
    @pl.when(k == pl.num_programs(1) - 1)
    def _finalize():
        pooled = jnp.max(acc_ref[...], axis=-1).astype(jnp.float32)  # (tn, C)
        h = jnp.dot(pooled, w1t_ref[...],
                    preferred_element_type=jnp.float32)              # (tn, hid)
        h = jnp.maximum(h, 0.0)                                      # ReLU
        out = jnp.dot(h, w2t_ref[...],
                      preferred_element_type=jnp.float32)            # (tn, C)
        o_ref[...] = jax.nn.sigmoid(out).astype(o_ref.dtype)         # Sigmoid


def channel_attention(x, w_fc1, w_fc2):
    """
    x:     (N, C, H, W)  (NCHW, same as PyTorch), float32 or bfloat16
    w_fc1: (C//16, C, 1, 1)  Conv2d(C, C//16, 1, bias=False).weight
    w_fc2: (C, C//16, 1, 1)  Conv2d(C//16, C, 1, bias=False).weight
    returns (N, C, 1, 1) in x.dtype
    """
    N, C, H, W = x.shape
    hidden = w_fc1.shape[0]
    assert w_fc1.shape == (hidden, C, 1, 1)
    assert w_fc2.shape == (C, hidden, 1, 1)

    HW = H * W
    x3 = x.reshape(N, C, HW)      # no padding copy, no dtype-cast pass

    itemsize = jnp.dtype(x3.dtype).itemsize
    # Running max in bf16 is exact, so accumulate natively for bf16 inputs
    # (halves fold VPU ops / VMEM bytes and the acc scratch on v6e/v7x).
    # TODO(synk): keep an f32 acc on v5e (no bf16 VALU) once chip gating lands.
    acc_dtype = jnp.bfloat16 if x3.dtype == jnp.bfloat16 else jnp.float32
    acc_itemsize = jnp.dtype(acc_dtype).itemsize

    # Batch tile: at most 8 rows per block; the last batch block may be ragged
    # (Pallas discards out-of-bounds output rows, and garbage rows never mix
    # with valid rows since everything is row-independent).
    # TODO(synk): for v7x 2-TC utilization with a single batch block, split the
    # parallel axis over channel groups and move the tiny FC/sigmoid out.
    tn = 8 if N >= 8 else N
    n_batch_blocks = pl.cdiv(N, tn)

    # Generation-aware VMEM budget (v5e/v6e: 128 MiB physical, v7x: 64 MiB).
    try:
        vmem_cap = int(pltpu.get_tpu_info().vmem_capacity_bytes)
    except Exception:
        vmem_cap = 64 * 1024 * 1024           # conservative (v7x-sized) fallback
    vmem_limit = min(int(vmem_cap * 0.7), 96 * 1024 * 1024)

    # Fixed VMEM: acc scratch + double-buffered weights + double-buffered out.
    fixed_bytes = (tn * C * _LANE * acc_itemsize
                   + 2 * 2 * (C * hidden) * 4
                   + 2 * tn * C * 4)
    headroom = 2 * 1024 * 1024
    input_budget = vmem_limit - fixed_bytes - headroom

    # Spatial tile: multiple of 128, largest candidate (capped at HW rounded up
    # to a lane) whose double-buffered input tile fits the budget.  The last
    # spatial block may be ragged; its tail lanes are masked in-kernel.
    hw_pad = _round_up(HW, _LANE)
    thw = _LANE
    for cand in (8192, 4096, 2048, 1024, 512, 256, 128):
        cand = min(cand, hw_pad)
        if 2 * tn * C * cand * itemsize <= input_budget:
            thw = cand
            break
    # Even if no candidate met the budget (huge C), make sure the minimal tile
    # still fits inside the compiler's scoped-VMEM limit.
    vmem_limit = max(vmem_limit,
                     2 * tn * C * thw * itemsize + fixed_bytes + headroom)
    vmem_limit = min(vmem_limit, vmem_cap)

    ragged = (HW % thw) != 0
    grid = (n_batch_blocks, pl.cdiv(HW, thw))

    # 1x1 convs as plain matmuls: pre-transpose the tiny weights.
    w1t = w_fc1.reshape(hidden, C).T.astype(jnp.float32)   # (C, hidden)
    w2t = w_fc2.reshape(C, hidden).T.astype(jnp.float32)   # (hidden, C)

    cost = pl.CostEstimate(
        flops=4 * N * C * hidden,                 # two (N,C)x(C,hid) matmuls
        transcendentals=N * C,                    # sigmoid
        bytes_accessed=(x3.size * itemsize        # streaming pooled read
                        + (w1t.size + w2t.size) * 4
                        + N * C * itemsize),
    )

    kernel = functools.partial(_channel_attention_kernel,
                               hw=HW, thw=thw, ragged=ragged)

    out = pl.pallas_call(
        kernel,
        out_shape=jax.ShapeDtypeStruct((N, C), x.dtype),
        grid=grid,
        in_specs=[
            # If profiling shows exposed DMA on short k loops, add
            # pipeline_mode=pl.Buffered(3) here.
            pl.BlockSpec((tn, C, thw), lambda i, k: (i, 0, k)),
            pl.BlockSpec((C, hidden), lambda i, k: (0, 0)),
            pl.BlockSpec((hidden, C), lambda i, k: (0, 0)),
        ],
        out_specs=pl.BlockSpec((tn, C), lambda i, k: (i, 0)),
        scratch_shapes=[pltpu.VMEM((tn, C, _LANE), acc_dtype)],
        compiler_params=pltpu.CompilerParams(
            dimension_semantics=("parallel", "arbitrary"),
            vmem_limit_bytes=int(vmem_limit),
        ),
        cost_estimate=cost,
    )(x3, w1t, w2t)

    return out.reshape(N, C, 1, 1)


def _reference(x, w_fc1, w_fc2):
    # Pure-JAX reference mirroring the PyTorch forward (max branch only).
    N, C, H, W = x.shape
    hidden = w_fc1.shape[0]
    pooled = jnp.max(x.reshape(N, C, H * W).astype(jnp.float32), axis=-1)
    h = jnp.maximum(pooled @ w_fc1.reshape(hidden, C).T.astype(jnp.float32), 0.0)
    out = h @ w_fc2.reshape(C, hidden).T.astype(jnp.float32)
    return jax.nn.sigmoid(out).reshape(N, C, 1, 1).astype(x.dtype)


if __name__ == "__main__":
    key = jax.random.PRNGKey(0)
    k_x, k_w1, k_w2, k_x2 = jax.random.split(key, 4)

    # --- Test 1: the module's natural small shape (f32, HW divides thw) ----
    N, C, H, W = 2, 64, 16, 16          # in_planes=64 -> hidden=4
    hidden = C // 16
    x = jax.random.normal(k_x, (N, C, H, W), dtype=jnp.float32)
    w_fc1 = jax.random.normal(k_w1, (hidden, C, 1, 1), dtype=jnp.float32) * 0.1
    w_fc2 = jax.random.normal(k_w2, (C, hidden, 1, 1), dtype=jnp.float32) * 0.1

    out = jax.block_until_ready(channel_attention(x, w_fc1, w_fc2))
    ref = _reference(x, w_fc1, w_fc2)
    assert out.shape == (N, C, 1, 1) and out.dtype == x.dtype
    assert jnp.allclose(out, ref, atol=1e-5, rtol=1e-5), "f32 mismatch"

    # --- Test 2: ragged spatial + ragged batch + bf16 accumulation path ----
    N2, C2, H2, W2 = 10, 32, 7, 7       # HW=49 (ragged), N=10 -> ragged batch
    hidden2 = C2 // 16
    x2 = jax.random.normal(k_x2, (N2, C2, H2, W2), dtype=jnp.bfloat16)
    w_fc1b = jax.random.normal(k_w1, (hidden2, C2, 1, 1), dtype=jnp.float32) * 0.1
    w_fc2b = jax.random.normal(k_w2, (C2, hidden2, 1, 1), dtype=jnp.float32) * 0.1

    out2 = jax.block_until_ready(channel_attention(x2, w_fc1b, w_fc2b))
    ref2 = _reference(x2, w_fc1b, w_fc2b)
    assert out2.shape == (N2, C2, 1, 1) and out2.dtype == jnp.bfloat16
    assert jnp.allclose(out2.astype(jnp.float32), ref2.astype(jnp.float32),
                        atol=1.5e-2, rtol=1.5e-2), "bf16/ragged mismatch"

    print("KERNEL_OK")
</pallas_src>

<mosaic_0001>
module attributes {stable_mosaic.version = 11 : i64} {
  func.func @_channel_attention_kernel(%arg0: i32, %arg1: i32, %arg2: memref<2x64x256xf32, #tpu.memory_space<vmem>>, %arg3: memref<64x4xf32, #tpu.memory_space<vmem>>, %arg4: memref<4x64xf32, #tpu.memory_space<vmem>>, %arg5: memref<2x64xf32, #tpu.memory_space<vmem>>, %arg6: memref<2x64x128xf32, #tpu.memory_space<vmem>>) attributes {dimension_semantics = [#tpu.dimension_semantics<parallel>, #tpu.dimension_semantics<arbitrary>], iteration_bounds = array<i64: 1, 1>, scalar_prefetch = 0 : i64, scratch_operands = 1 : i64, tpu.core_type = #tpu.core_type<tc>, window_params = [{transform_indices = @transform_0, window_bounds = array<i64: 2, 64, 256>}, {pipeline_mode = #tpu.pipeline_mode<synchronous>, transform_indices = @transform_1, window_bounds = array<i64: 64, 4>}, {pipeline_mode = #tpu.pipeline_mode<synchronous>, transform_indices = @transform_2, window_bounds = array<i64: 4, 64>}, {transform_indices = @transform_3, window_bounds = array<i64: 2, 64>}]} {
    %c0_i32 = arith.constant 0 : i32
    %0 = arith.cmpi eq, %arg1, %c0_i32 : i32
    %1 = arith.extui %0 : i1 to i32
    %c0_i32_0 = arith.constant 0 : i32
    %2 = arith.cmpi ne, %1, %c0_i32_0 : i32
    scf.if %2 {
      %cst = arith.constant 0xFF800000 : f32
      %12 = vector.broadcast %cst : f32 to vector<2x64x128xf32>
      %c0_13 = arith.constant 0 : index
      %c0_14 = arith.constant 0 : index
      %c0_15 = arith.constant 0 : index
      %13 = vector.load %arg6[%c0_13, %c0_14, %c0_15] : memref<2x64x128xf32, #tpu.memory_space<vmem>>, vector<2x64x128xf32>
      tpu.vector_store %arg6[%c0_13, %c0_14, %c0_15], %12 {strides = array<i32>} : memref<2x64x128xf32, #tpu.memory_space<vmem>>, vector<2x64x128xf32>,
    } else {
    }
    %c0 = arith.constant 0 : index
    %c0_1 = arith.constant 0 : index
    %c0_2 = arith.constant 0 : index
    %3 = vector.load %arg2[%c0, %c0_1, %c0_2] : memref<2x64x256xf32, #tpu.memory_space<vmem>>, vector<2x64x128xf32>
    %c0_3 = arith.constant 0 : index
    %c0_4 = arith.constant 0 : index
    %c128 = arith.constant 128 : index
    %4 = vector.load %arg2[%c0_3, %c0_4, %c128] : memref<2x64x256xf32, #tpu.memory_space<vmem>>, vector<2x64x128xf32>
    %5 = arith.maximumf %3, %4 : vector<2x64x128xf32>
    %c0_5 = arith.constant 0 : index
    %c0_6 = arith.constant 0 : index
    %c0_7 = arith.constant 0 : index
    %6 = vector.load %arg6[%c0_5, %c0_6, %c0_7] : memref<2x64x128xf32, #tpu.memory_space<vmem>>, vector<2x64x128xf32>
    %7 = arith.maximumf %6, %5 : vector<2x64x128xf32>
    %c0_8 = arith.constant 0 : index
    %c0_9 = arith.constant 0 : index
    %c0_10 = arith.constant 0 : index
    %8 = vector.load %arg6[%c0_8, %c0_9, %c0_10] : memref<2x64x128xf32, #tpu.memory_space<vmem>>, vector<2x64x128xf32>
    tpu.vector_store %arg6[%c0_8, %c0_9, %c0_10], %7 {strides = array<i32>} : memref<2x64x128xf32, #tpu.memory_space<vmem>>, vector<2x64x128xf32>,
    %c0_i32_11 = arith.constant 0 : i32
    %9 = arith.cmpi eq, %arg1, %c0_i32_11 : i32
    %10 = arith.extui %9 : i1 to i32
    %c0_i32_12 = arith.constant 0 : i32
    %11 = arith.cmpi ne, %10, %c0_i32_12 : i32
    scf.if %11 {
      %c0_13 = arith.constant 0 : index
      %c0_14 = arith.constant 0 : index
      %c0_15 = arith.constant 0 : index
      %12 = vector.load %arg6[%c0_13, %c0_14, %c0_15] : memref<2x64x128xf32, #tpu.memory_space<vmem>>, vector<2x64x128xf32>
      %cst = arith.constant dense<0xFF800000> : vector<2x64xf32>
      %13 = vector.multi_reduction <maximumf>, %12, %cst [2] : vector<2x64x128xf32> to vector<2x64xf32>
      %c0_16 = arith.constant 0 : index
      %c0_17 = arith.constant 0 : index
      %14 = vector.load %arg3[%c0_16, %c0_17] : memref<64x4xf32, #tpu.memory_space<vmem>>, vector<64x4xf32>
      %cst_18 = arith.constant dense<0.000000e+00> : vector<2x4xf32>
      %15 = tpu.matmul %13, %14, %cst_18 {dimension_numbers = #tpu.dot_dimension_numbers<[1], [0], [0], [1], [0, 0, 1, 1], [], []>} : vector<2x64xf32>, vector<64x4xf32>, vector<2x4xf32> -> vector<2x4xf32>
      %cst_19 = arith.constant 0.000000e+00 : f32
      %16 = vector.broadcast %cst_19 : f32 to vector<2x4xf32>
      %17 = arith.maximumf %15, %16 : vector<2x4xf32>
      %c0_20 = arith.constant 0 : index
      %c0_21 = arith.constant 0 : index
      %18 = vector.load %arg4[%c0_20, %c0_21] : memref<4x64xf32, #tpu.memory_space<vmem>>, vector<4x64xf32>
      %cst_22 = arith.constant dense<0.000000e+00> : vector<2x64xf32>
      %19 = tpu.matmul %17, %18, %cst_22 {dimension_numbers = #tpu.dot_dimension_numbers<[1], [0], [0], [1], [0, 0, 1, 1], [], []>} : vector<2x4xf32>, vector<4x64xf32>, vector<2x64xf32> -> vector<2x64xf32>
      %20 = arith.negf %19 : vector<2x64xf32>
      %21 = math.exp %20 : vector<2x64xf32>
      %cst_23 = arith.constant 1.000000e+00 : f32
      %22 = vector.broadcast %cst_23 : f32 to vector<2x64xf32>
      %23 = arith.addf %22, %21 : vector<2x64xf32>
      %24 = arith.divf %22, %23 : vector<2x64xf32>
      %c0_24 = arith.constant 0 : index
      %c0_25 = arith.constant 0 : index
      %25 = vector.load %arg5[%c0_24, %c0_25] : memref<2x64xf32, #tpu.memory_space<vmem>>, vector<2x64xf32>
      tpu.vector_store %arg5[%c0_24, %c0_25], %24 {strides = array<i32>} : memref<2x64xf32, #tpu.memory_space<vmem>>, vector<2x64xf32>,
    } else {
    }
    return
  }
  func.func @transform_0(%arg0: i32, %arg1: i32) -> (i32, i32, i32) {
    %c0_i32 = arith.constant 0 : i32
    %c0_i32_0 = arith.constant 0 : i32
    return %arg0, %c0_i32, %arg1 : i32, i32, i32
  }
  func.func @transform_1(%arg0: i32, %arg1: i32) -> (i32, i32) {
    %c0_i32 = arith.constant 0 : i32
    %c0_i32_0 = arith.constant 0 : i32
    %c0_i32_1 = arith.constant 0 : i32
    return %c0_i32, %c0_i32_0 : i32, i32
  }
  func.func @transform_2(%arg0: i32, %arg1: i32) -> (i32, i32) {
    %c0_i32 = arith.constant 0 : i32
    %c0_i32_0 = arith.constant 0 : i32
    %c0_i32_1 = arith.constant 0 : i32
    return %c0_i32, %c0_i32_0 : i32, i32
  }
  func.func @transform_3(%arg0: i32, %arg1: i32) -> (i32, i32) {
    %c0_i32 = arith.constant 0 : i32
    %c0_i32_0 = arith.constant 0 : i32
    return %arg0, %c0_i32 : i32, i32
  }
}

</mosaic_0001>

<bundles_post_ra>
// kernel: tpu_custom_call.1
= control target key start
LH: loop header
LB: loop body
LE: loop exit
PB: predicated region body
PF: predicated region fallthrough
CT: control target
= control target key end

     0   :  { %8 = vsyncpa [#allocation4], 0  ;;  %s654_s0 = inlined_call_operand.hbm [shape: f32[2,64,256], index: 0, kind: input, shape index: {}]   ;;  %s655_s1 = inlined_call_operand.vmem [shape: f32[64,4], index: 1, kind: input, shape index: {}]   ;;  %s656_s2 = inlined_call_operand.vmem [shape: f32[4,64], index: 2, kind: input, shape index: {}]   ;;  %s657_s3 = inlined_call_operand.hbm [shape: f32[2,64], index: 3, kind: output, shape index: {}]  }
   0x1   :  { %9 = vsyncpa [#allocation5], 0  ;;  %s585_s12 = smov [#allocation3]  }
   0x2   :  { %s15_s13 = sshll.u32 %s585_s12, 4  ;;  %s16_s13 = int_to_ptr.vmem [resolvable:$true] %s15_s13 }
   0x3   :  { %s549_s14 = scalar_lea.vmem %s16_s13, 4096  ;;  %p554_p1 = scmp.lt.s32.totalorder %s16_s13, %s16_s13 }
   0x4   :  { %p550_p0 = scmp.ne.s32.totalorder %s16_s13, %s549_s14  ;;  %p555_p2 = scmp.lt.s32.totalorder %s549_s14, %s549_s14 }
   0x6   :  { %p556_p3 = por %p555_p2, %p554_p1 }
   0x8   :  { %p557_p4 = pnand %p556_p3, %p550_p0 }
   0xa   :  { %560 = shalt.err (!%p557_p4)
}
   0xb   :  { %s586_s15 = smov 256   ;;  %s587_s16 = smov 16  }
   0xc   :  { %21 = dma.hbm_to_vmem [thread:$0]  %s654_s0, 4096, %s16_s13, [#allocation4], %s586_s15, %s586_s15, %s587_s16  }
   0xd   :  { %581 = dma.done.wait [#allocation4], 4096  }
   0xe   :  { %582 = vsyncadd [#allocation4], 4294963200  ;;  %v57_v0 = vld [vmem:[#allocation3 + $0x80] sm:$0xff]  ;;  %v73_v1 = vld [vmem:[#allocation3 + $0x88] sm:$0xff]  ;;  %v588_v48 = vmov 0.0   ;;  %vm589_vm0 = vmmov 0   ;;  %v220_v61 = vlaneseq }
   0xf   :  { %v49_v2 = vld [vmem:[#allocation3] sm:$0xff]  ;;  %v89_v3 = vmax.f32 %v57_v0, %v73_v1  ;;  %v65_v4 = vld [vmem:[#allocation3 + $0x8] sm:$0xff]  ;;  %v58_v5 = vld [vmem:[#allocation3 + $0x90] sm:$0xff]  ;;  %507 = vmatprep.subr.mxu0 %v588_v48  ;;  %526 = vmatprep.subr.mxu1 %v588_v48  ;;  %vm231_vm1 = vcmask 130112   ;;  %vm238_vm2 = vcmask 195712   ;;  %vm245_vm3 = vcmask 261312  }
  0x10   :  { %v74_v6 = vld [vmem:[#allocation3 + $0x98] sm:$0xff]  ;;  %v81_v7 = vmax.f32 %v49_v2, %v65_v4  ;;  %v50_v8 = vld [vmem:[#allocation3 + $0x10] sm:$0xff]  ;;  %v59_v12 = vld [vmem:[#allocation3 + $0xa0] sm:$0xff]  ;;  %523 = vmatprep.mubr.msk.f32.mxu0 %vm589_vm0, %v588_v48  ;;  %528 = vmatprep.mubr.msk.f32.mxu1 %vm589_vm0, %v588_v48  ;;  %v221_v0 = vand.u32 127, %v220_v61  ;;  %vm252_vm4 = vcmask 326912   ;;  %vm259_vm5 = vcmask 392512  }
  0x11   :  { %v66_v9 = vld [vmem:[#allocation3 + $0x18] sm:$0xff]  ;;  %180 = vmax.xlane.f32.xlu1 %v89_v3  ;;  %v90_v10 = vmax.f32 %v58_v5, %v74_v6  ;;  %v75_v13 = vld [vmem:[#allocation3 + $0xa8] sm:$0xff]  ;;  %v51_v14 = vld [vmem:[#allocation3 + $0x20] sm:$0xff]  ;;  %v223_v5 = vshrl.u32 %v220_v61, 7  ;;  %vm266_vm6 = vcmask 458112   ;;  %vm273_vm7 = vcmask 523712  }
  0x12   :  { %164 = vmax.xlane.f32.xlu0 %v81_v7  ;;  %v82_v11 = vmax.f32 %v50_v8, %v66_v9  ;;  %v67_v15 = vld [vmem:[#allocation3 + $0x28] sm:$0xff]  ;;  %v91_v16 = vmax.f32 %v59_v12, %v75_v13  ;;  %v60_v18 = vld [vmem:[#allocation3 + $0xb0] sm:$0xff]  ;;  %v76_v19 = vld [vmem:[#allocation3 + $0xb8] sm:$0xff]  ;;  %v226_v2 = vadd.s32 4294967288, %v221_v0  ;;  %v233_v4 = vadd.s32 4294967280, %v221_v0  ;;  %s590_s8 = smov [#allocation6]  }
  0x13   :  { %v83_v17 = vmax.f32 %v51_v14, %v67_v15  ;;  %v52_v20 = vld [vmem:[#allocation3 + $0x30] sm:$0xff]  ;;  %v68_v21 = vld [vmem:[#allocation3 + $0x38] sm:$0xff]  ;;  %v92_v22 = vmax.f32 %v60_v18, %v76_v19  ;;  %v61_v24 = vld [vmem:[#allocation3 + $0xc0] sm:$0xff]  ;;  %v240_v6 = vadd.s32 4294967272, %v221_v0  ;;  %v247_v7 = vadd.s32 4294967264, %v221_v0  ;;  %s483_s9 = sshll.u32 %s590_s8, 4  ;;  %s484_s9 = int_to_ptr.vmem [resolvable:$true] %s483_s9 }
  0x14   :  { %v84_v23 = vmax.f32 %v52_v20, %v68_v21  ;;  %v77_v25 = vld [vmem:[#allocation3 + $0xc8] sm:$0xff]  ;;  %v53_v26 = vld [vmem:[#allocation3 + $0x40] sm:$0xff]  ;;  %v62_v30 = vld [vmem:[#allocation3 + $0xd0] sm:$0xff]  ;;  %v229_v9 = vsub.s32 %v226_v2, %v223_v5  ;;  %v236_v12 = vsub.s32 %v233_v4, %v223_v5  ;;  %v261_v13 = vadd.s32 4294967248, %v221_v0  ;;  %p566_p6 = scmp.lt.s32.totalorder %s484_s9, %s484_s9 }
  0x15   :  { %182 = vmax.xlane.f32.xlu1 %v90_v10  ;;  %v69_v27 = vld [vmem:[#allocation3 + $0x48] sm:$0xff]  ;;  %v93_v28 = vmax.f32 %v61_v24, %v77_v25  ;;  %v78_v31 = vld [vmem:[#allocation3 + $0xd8] sm:$0xff]  ;;  %v54_v32 = vld [vmem:[#allocation3 + $0x50] sm:$0xff]  ;;  %v224_v14 = vsub.s32 %v221_v0, %v223_v5  ;;  %v243_v15 = vsub.s32 %v240_v6, %v223_v5  ;;  %v268_v21 = vadd.s32 4294967240, %v221_v0 }
  0x16   :  { %166 = vmax.xlane.f32.xlu0 %v82_v11  ;;  %v85_v29 = vmax.f32 %v53_v26, %v69_v27  ;;  %v70_v33 = vld [vmem:[#allocation3 + $0x58] sm:$0xff]  ;;  %v94_v34 = vmax.f32 %v62_v30, %v78_v31  ;;  %v63_v36 = vld [vmem:[#allocation3 + $0xe0] sm:$0xff]  ;;  %v79_v37 = vld [vmem:[#allocation3 + $0xe8] sm:$0xff]  ;;  %v254_v11 = vadd.s32 4294967256, %v221_v0  ;;  %v264_v24 = vsub.s32 %v261_v13, %v223_v5 }
  0x17   :  { %v86_v35 = vmax.f32 %v54_v32, %v70_v33  ;;  %v55_v38 = vld [vmem:[#allocation3 + $0x60] sm:$0xff]  ;;  %v71_v39 = vld [vmem:[#allocation3 + $0x68] sm:$0xff]  ;;  %v95_v40 = vmax.f32 %v63_v36, %v79_v37  ;;  %v64_v42 = vld [vmem:[#allocation3 + $0xf0] sm:$0xff]  ;;  %v271_v36 = vsub.s32 %v268_v21, %v223_v5  ;;  %vm314_vm8 = vcmask 1041409  }
  0x18   :  { %v87_v41 = vmax.f32 %v55_v38, %v71_v39  ;;  %v80_v43 = vld [vmem:[#allocation3 + $0xf8] sm:$0xff]  ;;  %v56_v44 = vld [vmem:[#allocation3 + $0x70] sm:$0xff]  ;;  %v201_v51 = vld [vmem:[%s655_s1 + $0x28] sm:$0xff]  ;;  %v257_v19 = vsub.s32 %v254_v11, %v223_v5  ;;  %vm316_vm9 = vcmask 523264   ;;  %vm395_vm10 = vcmask 1043456  }
  0x19   :  { %184 = vmax.xlane.f32.xlu1 %v91_v16  ;;  %v72_v45 = vld [vmem:[#allocation3 + $0x78] sm:$0xff]  ;;  %v96_v46 = vmax.f32 %v64_v42, %v80_v43  ;;  %v202_v50 = vld [vmem:[%s655_s1 + $0x30] sm:$0xff]  ;;  %v200_v52 = vld [vmem:[%s655_s1 + $0x20] sm:$0xff]  ;;  %v250_v16 = vsub.s32 %v247_v7, %v223_v5  ;;  %vm391_vm11 = vcmask 31744   ;;  %vm475_vm12 = vcmask 517120  }
  0x1a   :  { %168 = vmax.xlane.f32.xlu0 %v83_v17  ;;  %v88_v47 = vmax.f32 %v56_v44, %v72_v45  ;;  %v203_v49 = vld [vmem:[%s655_s1 + $0x38] sm:$0xff]  ;;  %v198_v54 = vld [vmem:[%s655_s1 + $0x10] sm:$0xff]  ;;  %v197_v55 = vld [vmem:[%s655_s1 + $0x8] sm:$0xff] }
  0x1b   :  { %508 = vmatpush3.msra.mxu0 %v203_v49  ;;  %v199_v53 = vld [vmem:[%s655_s1 + $0x18] sm:$0xff]  ;;  %v196_v56 = vld [vmem:[%s655_s1] sm:$0xff] }
  0x1c   :  { %509 = vmatprep.subr.mxu0 %v588_v48 }
  0x1d   :  { %186 = vmax.xlane.f32.xlu1 %v92_v22  ;;  %510 = vmatpush3.msra.mxu0 %v202_v50 }
  0x1e   :  { %170 = vmax.xlane.f32.xlu0 %v84_v23  ;;  %511 = vmatprep.subr.mxu0 %v588_v48 }
  0x1f   :  { %512 = vmatpush3.msra.mxu0 %v201_v51 }
  0x20   :  { %513 = vmatprep.subr.mxu0 %v588_v48 }
  0x21   :  { %188 = vmax.xlane.f32.xlu1 %v93_v28  ;;  %514 = vmatpush3.msra.mxu0 %v200_v52 }
  0x22   :  { %172 = vmax.xlane.f32.xlu0 %v85_v29  ;;  %515 = vmatprep.subr.mxu0 %v588_v48 }
  0x23   :  { %516 = vmatpush3.msra.mxu0 %v199_v53 }
  0x24   :  { %517 = vmatprep.subr.mxu0 %v588_v48 }
  0x25   :  { %190 = vmax.xlane.f32.xlu1 %v94_v34  ;;  %518 = vmatpush3.msra.mxu0 %v198_v54 }
  0x26   :  { %174 = vmax.xlane.f32.xlu0 %v86_v35  ;;  %519 = vmatprep.subr.mxu0 %v588_v48 }
  0x27   :  { %520 = vmatpush3.msra.mxu0 %v197_v55 }
  0x28   :  { %521 = vmatprep.subr.mxu0 %v588_v48 }
  0x29   :  { %192 = vmax.xlane.f32.xlu1 %v95_v40  ;;  %522 = vmatpush3.msra.mxu0 %v196_v56 }
  0x2a   :  { %176 = vmax.xlane.f32.xlu0 %v87_v41 }
  0x2d   :  { %194 = vmax.xlane.f32.xlu1 %v96_v46 }
  0x2e   :  { %178 = vmax.xlane.f32.xlu0 %v88_v47 }
  0x9a   :  { %v181_v57 = vpop.xlane.xlu1 %180 }
  0x9b   :  { %v165_v58 = vpop.xlane.xlu0 %164  ;;  %v278_v25 = vrot.slane %v181_v57, %v224_v14 }
  0x9c   :  { %v225_v28 = vrot.slane %v165_v58, %v224_v14  ;;  %v390_v58 = vld [vmem:[%s656_s2] sm:$0xf]  ;;  %s561_s2 = scalar_lea.vmem %s484_s9, 32 }
  0x9d   :  { %527 = vmatpush3.msk.msra.mxu1 %vm395_vm10, %v390_v58  ;;  %p562_p5 = scmp.ne.s32.totalorder %s484_s9, %s561_s2  ;;  %p567_p7 = scmp.lt.s32.totalorder %s561_s2, %s561_s2 }
  0x9e   :  { %v183_v59 = vpop.xlane.xlu1 %182 }
  0x9f   :  { %v167_v60 = vpop.xlane.xlu0 %166  ;;  %v282_v18 = vrot.slane %v183_v59, %v229_v9  ;;  %p568_p8 = por %p567_p7, %p566_p6 }
  0xa0   :  { %v230_v22 = vrot.slane %v167_v60, %v229_v9 }
  0xa1   :  { %v283_v32 = vsel %vm231_vm1, %v282_v18, %v278_v25  ;;  %p569_p9 = pnand %p568_p8, %p562_p5 }
  0xa2   :  { %v185_v62 = vpop.xlane.xlu1 %184  ;;  %v232_v37 = vsel %vm231_vm1, %v230_v22, %v225_v28 }
  0xa3   :  { %v169_v63 = vpop.xlane.xlu0 %168  ;;  %v287_v23 = vrot.slane %v185_v62, %v236_v12 }
  0xa4   :  { %v237_v26 = vrot.slane %v169_v63, %v236_v12 }
  0xa5   :  { %v288_v38 = vsel %vm238_vm2, %v287_v23, %v283_v32 }
  0xa6   :  { %v187_v1 = vpop.xlane.xlu1 %186  ;;  %v239_v41 = vsel %vm238_vm2, %v237_v26, %v232_v37 }
  0xa7   :  { %v171_v3 = vpop.xlane.xlu0 %170  ;;  %v292_v27 = vrot.slane %v187_v1, %v243_v15 }
  0xa8   :  { %v244_v29 = vrot.slane %v171_v3, %v243_v15 }
  0xa9   :  { %v293_v42 = vsel %vm245_vm3, %v292_v27, %v288_v38 }
  0xaa   :  { %v189_v8 = vpop.xlane.xlu1 %188  ;;  %v246_v44 = vsel %vm245_vm3, %v244_v29, %v239_v41 }
  0xab   :  { %v173_v10 = vpop.xlane.xlu0 %172  ;;  %v297_v30 = vrot.slane %v189_v8, %v250_v16 }
  0xac   :  { %v251_v33 = vrot.slane %v173_v10, %v250_v16 }
  0xad   :  { %v298_v45 = vsel %vm252_vm4, %v297_v30, %v293_v42 }
  0xae   :  { %v191_v17 = vpop.xlane.xlu1 %190  ;;  %v253_v47 = vsel %vm252_vm4, %v251_v33, %v246_v44 }
  0xaf   :  { %v175_v20 = vpop.xlane.xlu0 %174  ;;  %v302_v34 = vrot.slane %v191_v17, %v257_v19 }
  0xb0   :  { %v258_v39 = vrot.slane %v175_v20, %v257_v19 }
  0xb1   :  { %v303_v48 = vsel %vm259_vm5, %v302_v34, %v298_v45 }
  0xb2   :  { %v193_v31 = vpop.xlane.xlu1 %192  ;;  %v260_v51 = vsel %vm259_vm5, %v258_v39, %v253_v47 }
  0xb3   :  { %v177_v35 = vpop.xlane.xlu0 %176  ;;  %v307_v40 = vrot.slane %v193_v31, %v264_v24 }
  0xb4   :  { %v265_v43 = vrot.slane %v177_v35, %v264_v24 }
  0xb5   :  { %v308_v52 = vsel %vm266_vm6, %v307_v40, %v303_v48 }
  0xb6   :  { %v195_v46 = vpop.xlane.xlu1 %194  ;;  %v267_v54 = vsel %vm266_vm6, %v265_v43, %v260_v51 }
  0xb7   :  { %v312_v49 = vrot.slane %v195_v46, %v271_v36  ;;  %v179_v50 = vpop.xlane.xlu0 %178 }
  0xb8   :  { %v272_v53 = vrot.slane %v179_v50, %v271_v36 }
  0xb9   :  { %v313_v55 = vsel %vm273_vm7, %v312_v49, %v308_v52 }
  0xba   :  { %v274_v56 = vsel %vm273_vm7, %v272_v53, %v267_v54 }
  0xbb   :  { %v315_v57 = vsel %vm314_vm8, %v313_v55, %v274_v56 }
  0xbc   :  { %524 = vmatmul.mubr.msk.f32.vlgmr.msra.gmra.mxu0 %vm316_vm9, %v315_v57 }
 0x17c   :  { %v385_v59 = vpop.f32.mrf.mxu0 }
 0x17d   :  { %v389_v60 = vmax.f32 %v385_v59, 0.0 }
 0x17e   :  { %v525_v61 = vpop.f32.mrf.mxu0 }
 0x17f   :  { %529 = vmatmul.mubr.msk.f32.vlgmr.msra.gmra.mxu1 %vm391_vm11, %v389_v60 }
 0x23f   :  { %v465_v62 = vpop.f32.mrf.mxu1 }
 0x240   :  { %v495_v63 = vmul.f32 -1.442695, %v465_v62 }
 0x241   :  { %v530_v0 = vpop.f32.mrf.mxu1 }
 0x242   :  { %537 = vpow2.f32 %v495_v63 }
 0x24f   :  { %v538_v1 = vpop.eup %537 }
 0x250   :  { %v472_v2 = vadd.f32 1.0, %v538_v1 }
 0x252   :  { %539 = vrcp.f32 %v472_v2 }
 0x25f   :  { %v540_v3 = vpop.eup %539 }
 0x260   :  { %476 = vst.msk [vmem:[#allocation6] sm:$0x3] %vm475_vm12, %v540_v3 }
 0x261   :  { %572 = shalt.err (!%p569_p9)
}
 0x262   :  { %486 = dma.vmem_to_hbm [thread:$0]  %s484_s9, 32, %s657_s3, [#allocation5]  }
 0x263   :  { %583 = dma.done.wait [#allocation5], 32  }
 0x264   :  { %584 = vsyncadd [#allocation5], 4294967264 }
 0x265   :  { %490 = vsyncpa [#allocation4], 1 }
 0x266   :  { %491 = vsyncpa [#allocation5], 1 }

</bundles_post_ra>
